<compile_context>
chip_gen: v5e
topology: v5e:2x2
jax: 0.10.0
libtpu: 0.0.40
codegen_flags: <defaults>
</compile_context>

<pallas_src>
import jax
import jax.numpy as jnp
from jax.experimental import pallas as pl
from jax.experimental.pallas import tpu as pltpu


# --------------------------------------------------------------------------- #
# Tile-size / budget selection
# --------------------------------------------------------------------------- #
def _vmem_capacity_bytes() -> int:
    try:
        return int(pltpu.get_tpu_info().vmem_capacity_bytes)
    except Exception:
        return 64 << 20  # conservative fallback (v7x per-core VMEM)


def _pick_spatial_blocks(n: int, s128: int, c_in: int, c_out: int,
                         itemsize: int) -> tuple[int, int]:
    """Choose (R, num_blocks).

    Each grid step moves one (C_in, R, 128) x-tile and one (C_out, R, 128)
    out-tile.  R is sized from a ~4 MiB bytes-per-step target and a
    generation-aware in-flight VMEM budget (double-buffered x + out).
    """
    bytes_per_r = (c_in + c_out) * 128 * itemsize
    total_bytes = n * s128 * bytes_per_r

    # Tiny problems: one step per batch element minimizes fixed per-step cost.
    if total_bytes <= (4 << 20):
        return s128, 1

    vmem_cap = _vmem_capacity_bytes()
    inflight_budget = min(24 << 20, vmem_cap // 4)   # double-buffered x + out
    target_step_bytes = 4 << 20                      # ~4 MiB of x+out per step

    r_cap = min(target_step_bytes // bytes_per_r,
                inflight_budget // (2 * bytes_per_r))
    r_cap = max(8, (r_cap // 8) * 8)

    num_blocks = pl.cdiv(s128, min(r_cap, s128))

    # Megacore (v7x: 2 TCs) + pipeline depth: aim for >= 8 total grid steps.
    min_steps = 8
    if n * num_blocks < min_steps:
        want = min(pl.cdiv(min_steps, n), max(1, s128 // 8))
        num_blocks = max(num_blocks, want)

    # Balance R across blocks (multiple of 8) to minimize padding waste.
    r = pl.cdiv(pl.cdiv(s128, num_blocks), 8) * 8
    if r >= s128:
        return s128, 1
    return r, pl.cdiv(s128, r)


# --------------------------------------------------------------------------- #
# Kernels
# --------------------------------------------------------------------------- #
def _make_vpu_kernel(c_in: int, c_out: int):
    """Tiny-channel path: sublane-dense (C, R, 128) tiles, SMEM scalar weights."""
    def kernel(x_ref, w_ref, b_ref, o_ref):
        # x_ref: VMEM (C_in, R, 128); w_ref: SMEM (C_out*C_in,); b_ref: SMEM (C_out,)
        # o_ref: VMEM (C_out, R, 128)
        x = x_ref[...].astype(jnp.float32)
        for o in range(c_out):
            acc = x[0] * w_ref[o * c_in + 0]          # SMEM scalar * (R,128) VPU bcast
            for k in range(1, c_in):
                acc = acc + x[k] * w_ref[o * c_in + k]
            o_ref[o] = (acc + b_ref[o]).astype(o_ref.dtype)
    return kernel


def _mxu_kernel(x_ref, w_ref, b_ref, o_ref):
    """Large-channel path: (C_out,C_in) @ (C_in,L) on the MXU."""
    acc = jnp.dot(w_ref[...], x_ref[...], preferred_element_type=jnp.float32)
    o_ref[...] = (acc + b_ref[...]).astype(o_ref.dtype)


# --------------------------------------------------------------------------- #
# Forward
# --------------------------------------------------------------------------- #
def confidence_estimator_forward(x_nchw, w_fine, b_fine):
    """Equivalent of ConfidenceEstimator.forward: 1x1 conv (confidence_fine).

    x_nchw : (N, C_in, H, W) float32
    w_fine : (C_out, C_in, 1, 1) float32  (torch Conv2d weight layout)
    b_fine : (C_out,) float32
    returns (N, C_out, H, W) float32
    """
    N, C_in, H, W = x_nchw.shape
    C_out = w_fine.shape[0]
    S = H * W
    itemsize = jnp.dtype(x_nchw.dtype).itemsize

    s128 = pl.cdiv(S, 128)
    R, num_blocks = _pick_spatial_blocks(N, s128, C_in, C_out, itemsize)
    S_pad = num_blocks * R * 128

    x_flat = x_nchw.reshape(N, C_in, S)
    if S_pad != S:
        x_flat = jnp.pad(x_flat, ((0, 0), (0, 0), (0, S_pad - S)))

    # MXU only when the contraction is substantial; otherwise the VPU loop is
    # free under the DMAs.  Also route big weight tensors to VMEM/MXU so SMEM
    # and the unrolled FMA loop stay small.
    use_mxu = (C_in >= 32 and C_out >= 8) or (C_in * C_out > 1024)

    vmem_cap = _vmem_capacity_bytes()
    vmem_limit = int(min(64 << 20, vmem_cap // 2))

    cost = pl.CostEstimate(
        flops=2 * N * S_pad * C_in * C_out,
        transcendentals=0,
        bytes_accessed=itemsize * (N * S_pad * (C_in + C_out) + C_in * C_out + C_out),
    )
    cparams = pltpu.CompilerParams(
        dimension_semantics=("parallel", "parallel"),
        vmem_limit_bytes=vmem_limit,
    )

    if not use_mxu:
        # Sublane-dense tiles: (N, C_in, S/128, 128) is a free view of NCHW data.
        x4 = x_flat.reshape(N, C_in, num_blocks * R, 128)
        w_flat = w_fine.reshape(C_out * C_in)   # 1-D in SMEM: minimal padding
        b_vec = b_fine.reshape(C_out)

        out4 = pl.pallas_call(
            _make_vpu_kernel(C_in, C_out),
            out_shape=jax.ShapeDtypeStruct((N, C_out, num_blocks * R, 128),
                                           x_nchw.dtype),
            grid_spec=pltpu.PrefetchScalarGridSpec(
                num_scalar_prefetch=0,
                grid=(N, num_blocks),
                in_specs=[
                    pl.BlockSpec((None, C_in, R, 128), lambda n, s: (n, 0, s, 0)),
                    pl.BlockSpec(memory_space=pltpu.MemorySpace.SMEM),
                    pl.BlockSpec(memory_space=pltpu.MemorySpace.SMEM),
                ],
                out_specs=pl.BlockSpec((None, C_out, R, 128),
                                       lambda n, s: (n, 0, s, 0)),
            ),
            compiler_params=cparams,
            cost_estimate=cost,
        )(x4, w_flat, b_vec)
        out_flat = out4.reshape(N, C_out, S_pad)
    else:
        L = R * 128
        w_mat = w_fine.reshape(C_out, C_in)
        b_col = b_fine.reshape(C_out, 1)
        out_flat = pl.pallas_call(
            _mxu_kernel,
            out_shape=jax.ShapeDtypeStruct((N, C_out, S_pad), x_nchw.dtype),
            grid_spec=pltpu.PrefetchScalarGridSpec(
                num_scalar_prefetch=0,
                grid=(N, num_blocks),
                in_specs=[
                    pl.BlockSpec((None, C_in, L), lambda n, s: (n, 0, s)),
                    pl.BlockSpec((C_out, C_in), lambda n, s: (0, 0)),
                    pl.BlockSpec((C_out, 1), lambda n, s: (0, 0)),
                ],
                out_specs=pl.BlockSpec((None, C_out, L), lambda n, s: (n, 0, s)),
            ),
            compiler_params=cparams,
            cost_estimate=cost,
        )(x_flat, w_mat, b_col)

    if S_pad != S:
        out_flat = out_flat[:, :, :S]
    return out_flat.reshape(N, C_out, H, W)


# --------------------------------------------------------------------------- #
# Parameters (shapes match the torch module)
# --------------------------------------------------------------------------- #
def init_params(key, in_channels, out_channels):
    k1, k2, k3, k4 = jax.random.split(key, 4)
    # confidence_coarse: Conv2d(in, out, 3, padding=1) -- created but unused in forward.
    w_coarse = jax.random.normal(k1, (out_channels, in_channels, 3, 3), jnp.float32) * 0.05
    b_coarse = jax.random.normal(k2, (out_channels,), jnp.float32) * 0.05
    # confidence_fine: Conv2d(in, out, 1) -- the forward path.
    w_fine = jax.random.normal(k3, (out_channels, in_channels, 1, 1), jnp.float32) * 0.05
    b_fine = jax.random.normal(k4, (out_channels,), jnp.float32) * 0.05
    return dict(w_coarse=w_coarse, b_coarse=b_coarse, w_fine=w_fine, b_fine=b_fine)


if __name__ == "__main__":
    N, C_in, H, W = 2, 4, 16, 16
    C_out = 4

    key = jax.random.PRNGKey(0)
    kx, kp = jax.random.split(key)
    x = jax.random.normal(kx, (N, C_in, H, W), jnp.float32)
    params = init_params(kp, C_in, C_out)

    out = confidence_estimator_forward(x, params["w_fine"], params["b_fine"])
    out = jax.block_until_ready(out)

    # Reference check (pure JAX 1x1 conv).
    ref = (
        jnp.einsum("nchw,oc->nohw", x, params["w_fine"].reshape(C_out, C_in))
        + params["b_fine"][None, :, None, None]
    )
    assert out.shape == (N, C_out, H, W)
    assert jnp.allclose(out, ref, atol=1e-5, rtol=1e-5)

    print("KERNEL_OK")
</pallas_src>

<mosaic_0001>
module attributes {stable_mosaic.version = 11 : i64} {
  func.func @kernel(%arg0: i32, %arg1: i32, %arg2: memref<1x4x2x128xf32, #tpu.memory_space<vmem>>, %arg3: memref<16xf32, #tpu.memory_space<smem>>, %arg4: memref<4xf32, #tpu.memory_space<smem>>, %arg5: memref<1x4x2x128xf32, #tpu.memory_space<vmem>>) attributes {dimension_semantics = [#tpu.dimension_semantics<parallel>, #tpu.dimension_semantics<parallel>], iteration_bounds = array<i64: 2, 1>, scalar_prefetch = 0 : i64, scratch_operands = 0 : i64, tpu.core_type = #tpu.core_type<tc>, window_params = [{transform_indices = @transform_0, window_bounds = array<i64: 1, 4, 2, 128>}, {transform_indices = @transform_1, window_bounds = array<i64: 16>}, {transform_indices = @transform_2, window_bounds = array<i64: 4>}, {transform_indices = @transform_3, window_bounds = array<i64: 1, 4, 2, 128>}]} {
    %c0 = arith.constant 0 : index
    %c0_0 = arith.constant 0 : index
    %c0_1 = arith.constant 0 : index
    %c0_2 = arith.constant 0 : index
    %0 = vector.load %arg2[%c0, %c0_0, %c0_1, %c0_2] : memref<1x4x2x128xf32, #tpu.memory_space<vmem>>, vector<1x4x2x128xf32>
    %1 = vector.shape_cast %0 : vector<1x4x2x128xf32> to vector<4x2x128xf32>
    %2 = vector.extract_strided_slice %1 {offsets = [0, 0, 0], sizes = [1, 2, 128], strides = [1, 1, 1]} : vector<4x2x128xf32> to vector<1x2x128xf32>
    %3 = vector.shape_cast %2 : vector<1x2x128xf32> to vector<2x128xf32>
    %c0_3 = arith.constant 0 : index
    %4 = memref.load %arg3[%c0_3] : memref<16xf32, #tpu.memory_space<smem>>
    %5 = vector.broadcast %4 : f32 to vector<2x128xf32>
    %6 = arith.mulf %3, %5 : vector<2x128xf32>
    %7 = vector.extract_strided_slice %1 {offsets = [1, 0, 0], sizes = [1, 2, 128], strides = [1, 1, 1]} : vector<4x2x128xf32> to vector<1x2x128xf32>
    %8 = vector.shape_cast %7 : vector<1x2x128xf32> to vector<2x128xf32>
    %c1 = arith.constant 1 : index
    %9 = memref.load %arg3[%c1] : memref<16xf32, #tpu.memory_space<smem>>
    %10 = vector.broadcast %9 : f32 to vector<2x128xf32>
    %11 = arith.mulf %8, %10 : vector<2x128xf32>
    %12 = arith.addf %6, %11 : vector<2x128xf32>
    %13 = vector.extract_strided_slice %1 {offsets = [2, 0, 0], sizes = [1, 2, 128], strides = [1, 1, 1]} : vector<4x2x128xf32> to vector<1x2x128xf32>
    %14 = vector.shape_cast %13 : vector<1x2x128xf32> to vector<2x128xf32>
    %c2 = arith.constant 2 : index
    %15 = memref.load %arg3[%c2] : memref<16xf32, #tpu.memory_space<smem>>
    %16 = vector.broadcast %15 : f32 to vector<2x128xf32>
    %17 = arith.mulf %14, %16 : vector<2x128xf32>
    %18 = arith.addf %12, %17 : vector<2x128xf32>
    %19 = vector.extract_strided_slice %1 {offsets = [3, 0, 0], sizes = [1, 2, 128], strides = [1, 1, 1]} : vector<4x2x128xf32> to vector<1x2x128xf32>
    %20 = vector.shape_cast %19 : vector<1x2x128xf32> to vector<2x128xf32>
    %c3 = arith.constant 3 : index
    %21 = memref.load %arg3[%c3] : memref<16xf32, #tpu.memory_space<smem>>
    %22 = vector.broadcast %21 : f32 to vector<2x128xf32>
    %23 = arith.mulf %20, %22 : vector<2x128xf32>
    %24 = arith.addf %18, %23 : vector<2x128xf32>
    %c0_4 = arith.constant 0 : index
    %25 = memref.load %arg4[%c0_4] : memref<4xf32, #tpu.memory_space<smem>>
    %26 = vector.broadcast %25 : f32 to vector<2x128xf32>
    %27 = arith.addf %24, %26 : vector<2x128xf32>
    %c0_5 = arith.constant 0 : index
    %c0_6 = arith.constant 0 : index
    %c0_7 = arith.constant 0 : index
    %c0_8 = arith.constant 0 : index
    %28 = vector.load %arg5[%c0_5, %c0_6, %c0_7, %c0_8] : memref<1x4x2x128xf32, #tpu.memory_space<vmem>>, vector<1x1x2x128xf32>
    %29 = vector.shape_cast %28 : vector<1x1x2x128xf32> to vector<2x128xf32>
    %30 = vector.shape_cast %27 : vector<2x128xf32> to vector<1x1x2x128xf32>
    tpu.vector_store %arg5[%c0_5, %c0_6, %c0_7, %c0_8], %30 {strides = array<i32>} : memref<1x4x2x128xf32, #tpu.memory_space<vmem>>, vector<1x1x2x128xf32>,
    %31 = vector.extract_strided_slice %1 {offsets = [0, 0, 0], sizes = [1, 2, 128], strides = [1, 1, 1]} : vector<4x2x128xf32> to vector<1x2x128xf32>
    %32 = vector.shape_cast %31 : vector<1x2x128xf32> to vector<2x128xf32>
    %c4 = arith.constant 4 : index
    %33 = memref.load %arg3[%c4] : memref<16xf32, #tpu.memory_space<smem>>
    %34 = vector.broadcast %33 : f32 to vector<2x128xf32>
    %35 = arith.mulf %32, %34 : vector<2x128xf32>
    %36 = vector.extract_strided_slice %1 {offsets = [1, 0, 0], sizes = [1, 2, 128], strides = [1, 1, 1]} : vector<4x2x128xf32> to vector<1x2x128xf32>
    %37 = vector.shape_cast %36 : vector<1x2x128xf32> to vector<2x128xf32>
    %c5 = arith.constant 5 : index
    %38 = memref.load %arg3[%c5] : memref<16xf32, #tpu.memory_space<smem>>
    %39 = vector.broadcast %38 : f32 to vector<2x128xf32>
    %40 = arith.mulf %37, %39 : vector<2x128xf32>
    %41 = arith.addf %35, %40 : vector<2x128xf32>
    %42 = vector.extract_strided_slice %1 {offsets = [2, 0, 0], sizes = [1, 2, 128], strides = [1, 1, 1]} : vector<4x2x128xf32> to vector<1x2x128xf32>
    %43 = vector.shape_cast %42 : vector<1x2x128xf32> to vector<2x128xf32>
    %c6 = arith.constant 6 : index
    %44 = memref.load %arg3[%c6] : memref<16xf32, #tpu.memory_space<smem>>
    %45 = vector.broadcast %44 : f32 to vector<2x128xf32>
    %46 = arith.mulf %43, %45 : vector<2x128xf32>
    %47 = arith.addf %41, %46 : vector<2x128xf32>
    %48 = vector.extract_strided_slice %1 {offsets = [3, 0, 0], sizes = [1, 2, 128], strides = [1, 1, 1]} : vector<4x2x128xf32> to vector<1x2x128xf32>
    %49 = vector.shape_cast %48 : vector<1x2x128xf32> to vector<2x128xf32>
    %c7 = arith.constant 7 : index
    %50 = memref.load %arg3[%c7] : memref<16xf32, #tpu.memory_space<smem>>
    %51 = vector.broadcast %50 : f32 to vector<2x128xf32>
    %52 = arith.mulf %49, %51 : vector<2x128xf32>
    %53 = arith.addf %47, %52 : vector<2x128xf32>
    %c1_9 = arith.constant 1 : index
    %54 = memref.load %arg4[%c1_9] : memref<4xf32, #tpu.memory_space<smem>>
    %55 = vector.broadcast %54 : f32 to vector<2x128xf32>
    %56 = arith.addf %53, %55 : vector<2x128xf32>
    %c0_10 = arith.constant 0 : index
    %c1_11 = arith.constant 1 : index
    %c0_12 = arith.constant 0 : index
    %c0_13 = arith.constant 0 : index
    %57 = vector.load %arg5[%c0_10, %c1_11, %c0_12, %c0_13] : memref<1x4x2x128xf32, #tpu.memory_space<vmem>>, vector<1x1x2x128xf32>
    %58 = vector.shape_cast %57 : vector<1x1x2x128xf32> to vector<2x128xf32>
    %59 = vector.shape_cast %56 : vector<2x128xf32> to vector<1x1x2x128xf32>
    tpu.vector_store %arg5[%c0_10, %c1_11, %c0_12, %c0_13], %59 {strides = array<i32>} : memref<1x4x2x128xf32, #tpu.memory_space<vmem>>, vector<1x1x2x128xf32>,
    %60 = vector.extract_strided_slice %1 {offsets = [0, 0, 0], sizes = [1, 2, 128], strides = [1, 1, 1]} : vector<4x2x128xf32> to vector<1x2x128xf32>
    %61 = vector.shape_cast %60 : vector<1x2x128xf32> to vector<2x128xf32>
    %c8 = arith.constant 8 : index
    %62 = memref.load %arg3[%c8] : memref<16xf32, #tpu.memory_space<smem>>
    %63 = vector.broadcast %62 : f32 to vector<2x128xf32>
    %64 = arith.mulf %61, %63 : vector<2x128xf32>
    %65 = vector.extract_strided_slice %1 {offsets = [1, 0, 0], sizes = [1, 2, 128], strides = [1, 1, 1]} : vector<4x2x128xf32> to vector<1x2x128xf32>
    %66 = vector.shape_cast %65 : vector<1x2x128xf32> to vector<2x128xf32>
    %c9 = arith.constant 9 : index
    %67 = memref.load %arg3[%c9] : memref<16xf32, #tpu.memory_space<smem>>
    %68 = vector.broadcast %67 : f32 to vector<2x128xf32>
    %69 = arith.mulf %66, %68 : vector<2x128xf32>
    %70 = arith.addf %64, %69 : vector<2x128xf32>
    %71 = vector.extract_strided_slice %1 {offsets = [2, 0, 0], sizes = [1, 2, 128], strides = [1, 1, 1]} : vector<4x2x128xf32> to vector<1x2x128xf32>
    %72 = vector.shape_cast %71 : vector<1x2x128xf32> to vector<2x128xf32>
    %c10 = arith.constant 10 : index
    %73 = memref.load %arg3[%c10] : memref<16xf32, #tpu.memory_space<smem>>
    %74 = vector.broadcast %73 : f32 to vector<2x128xf32>
    %75 = arith.mulf %72, %74 : vector<2x128xf32>
    %76 = arith.addf %70, %75 : vector<2x128xf32>
    %77 = vector.extract_strided_slice %1 {offsets = [3, 0, 0], sizes = [1, 2, 128], strides = [1, 1, 1]} : vector<4x2x128xf32> to vector<1x2x128xf32>
    %78 = vector.shape_cast %77 : vector<1x2x128xf32> to vector<2x128xf32>
    %c11 = arith.constant 11 : index
    %79 = memref.load %arg3[%c11] : memref<16xf32, #tpu.memory_space<smem>>
    %80 = vector.broadcast %79 : f32 to vector<2x128xf32>
    %81 = arith.mulf %78, %80 : vector<2x128xf32>
    %82 = arith.addf %76, %81 : vector<2x128xf32>
    %c2_14 = arith.constant 2 : index
    %83 = memref.load %arg4[%c2_14] : memref<4xf32, #tpu.memory_space<smem>>
    %84 = vector.broadcast %83 : f32 to vector<2x128xf32>
    %85 = arith.addf %82, %84 : vector<2x128xf32>
    %c0_15 = arith.constant 0 : index
    %c2_16 = arith.constant 2 : index
    %c0_17 = arith.constant 0 : index
    %c0_18 = arith.constant 0 : index
    %86 = vector.load %arg5[%c0_15, %c2_16, %c0_17, %c0_18] : memref<1x4x2x128xf32, #tpu.memory_space<vmem>>, vector<1x1x2x128xf32>
    %87 = vector.shape_cast %86 : vector<1x1x2x128xf32> to vector<2x128xf32>
    %88 = vector.shape_cast %85 : vector<2x128xf32> to vector<1x1x2x128xf32>
    tpu.vector_store %arg5[%c0_15, %c2_16, %c0_17, %c0_18], %88 {strides = array<i32>} : memref<1x4x2x128xf32, #tpu.memory_space<vmem>>, vector<1x1x2x128xf32>,
    %89 = vector.extract_strided_slice %1 {offsets = [0, 0, 0], sizes = [1, 2, 128], strides = [1, 1, 1]} : vector<4x2x128xf32> to vector<1x2x128xf32>
    %90 = vector.shape_cast %89 : vector<1x2x128xf32> to vector<2x128xf32>
    %c12 = arith.constant 12 : index
    %91 = memref.load %arg3[%c12] : memref<16xf32, #tpu.memory_space<smem>>
    %92 = vector.broadcast %91 : f32 to vector<2x128xf32>
    %93 = arith.mulf %90, %92 : vector<2x128xf32>
    %94 = vector.extract_strided_slice %1 {offsets = [1, 0, 0], sizes = [1, 2, 128], strides = [1, 1, 1]} : vector<4x2x128xf32> to vector<1x2x128xf32>
    %95 = vector.shape_cast %94 : vector<1x2x128xf32> to vector<2x128xf32>
    %c13 = arith.constant 13 : index
    %96 = memref.load %arg3[%c13] : memref<16xf32, #tpu.memory_space<smem>>
    %97 = vector.broadcast %96 : f32 to vector<2x128xf32>
    %98 = arith.mulf %95, %97 : vector<2x128xf32>
    %99 = arith.addf %93, %98 : vector<2x128xf32>
    %100 = vector.extract_strided_slice %1 {offsets = [2, 0, 0], sizes = [1, 2, 128], strides = [1, 1, 1]} : vector<4x2x128xf32> to vector<1x2x128xf32>
    %101 = vector.shape_cast %100 : vector<1x2x128xf32> to vector<2x128xf32>
    %c14 = arith.constant 14 : index
    %102 = memref.load %arg3[%c14] : memref<16xf32, #tpu.memory_space<smem>>
    %103 = vector.broadcast %102 : f32 to vector<2x128xf32>
    %104 = arith.mulf %101, %103 : vector<2x128xf32>
    %105 = arith.addf %99, %104 : vector<2x128xf32>
    %106 = vector.extract_strided_slice %1 {offsets = [3, 0, 0], sizes = [1, 2, 128], strides = [1, 1, 1]} : vector<4x2x128xf32> to vector<1x2x128xf32>
    %107 = vector.shape_cast %106 : vector<1x2x128xf32> to vector<2x128xf32>
    %c15 = arith.constant 15 : index
    %108 = memref.load %arg3[%c15] : memref<16xf32, #tpu.memory_space<smem>>
    %109 = vector.broadcast %108 : f32 to vector<2x128xf32>
    %110 = arith.mulf %107, %109 : vector<2x128xf32>
    %111 = arith.addf %105, %110 : vector<2x128xf32>
    %c3_19 = arith.constant 3 : index
    %112 = memref.load %arg4[%c3_19] : memref<4xf32, #tpu.memory_space<smem>>
    %113 = vector.broadcast %112 : f32 to vector<2x128xf32>
    %114 = arith.addf %111, %113 : vector<2x128xf32>
    %c0_20 = arith.constant 0 : index
    %c3_21 = arith.constant 3 : index
    %c0_22 = arith.constant 0 : index
    %c0_23 = arith.constant 0 : index
    %115 = vector.load %arg5[%c0_20, %c3_21, %c0_22, %c0_23] : memref<1x4x2x128xf32, #tpu.memory_space<vmem>>, vector<1x1x2x128xf32>
    %116 = vector.shape_cast %115 : vector<1x1x2x128xf32> to vector<2x128xf32>
    %117 = vector.shape_cast %114 : vector<2x128xf32> to vector<1x1x2x128xf32>
    tpu.vector_store %arg5[%c0_20, %c3_21, %c0_22, %c0_23], %117 {strides = array<i32>} : memref<1x4x2x128xf32, #tpu.memory_space<vmem>>, vector<1x1x2x128xf32>,
    return
  }
  func.func @transform_0(%arg0: i32, %arg1: i32) -> (i32, i32, i32, i32) {
    %c0_i32 = arith.constant 0 : i32
    %c0_i32_0 = arith.constant 0 : i32
    %c0_i32_1 = arith.constant 0 : i32
    return %arg0, %c0_i32, %arg1, %c0_i32_0 : i32, i32, i32, i32
  }
  func.func @transform_1(%arg0: i32, %arg1: i32) -> i32 {
    %c0_i32 = arith.constant 0 : i32
    %c0_i32_0 = arith.constant 0 : i32
    return %c0_i32 : i32
  }
  func.func @transform_2(%arg0: i32, %arg1: i32) -> i32 {
    %c0_i32 = arith.constant 0 : i32
    %c0_i32_0 = arith.constant 0 : i32
    return %c0_i32 : i32
  }
  func.func @transform_3(%arg0: i32, %arg1: i32) -> (i32, i32, i32, i32) {
    %c0_i32 = arith.constant 0 : i32
    %c0_i32_0 = arith.constant 0 : i32
    %c0_i32_1 = arith.constant 0 : i32
    return %arg0, %c0_i32, %arg1, %c0_i32_0 : i32, i32, i32, i32
  }
}

</mosaic_0001>

<bundles_post_ra>
// kernel: tpu_custom_call.1
= control target key start
LH: loop header
LB: loop body
LE: loop exit
PB: predicated region body
PF: predicated region fallthrough
CT: control target
= control target key end

     0   :  { %s941_s0 = inlined_call_operand.hbm [shape: f32[2,4,2,128], index: 0, kind: input, shape index: {}]   ;;  %s942_s1 = inlined_call_operand.hbm [shape: f32[16], index: 1, kind: input, shape index: {}]   ;;  %s943_s2 = inlined_call_operand.vmem [shape: f32[4], index: 2, kind: input, shape index: {}]   ;;  %s944_s3 = inlined_call_operand.hbm [shape: f32[2,4,2,128], index: 3, kind: output, shape index: {}]  }
   0x1   :  { %945 = sst [smem:[#allocation14_spill]] %s942_s1 }
   0x2   :  { %8 = vsyncpa [#allocation3], 0 }
   0x3   :  { %10 = vsyncpa [#allocation3 + $0x1], 0 }
   0x4   :  { %11 = vsyncpa [#allocation5], 0 }
   0x5   :  { %12 = vsyncpa [#allocation6], 0 }
   0x6   :  { %13 = vsyncpa [#allocation4], 0 }
   0x7   :  { %15 = vsyncpa [#allocation4 + $0x1], 0  ;;  %s751_s12 = smov 0   ;;  %s753_s13 = smov 0  }
   0x8   :  { %s755_s14 = smov 0   ;;  %s757_s15 = smov 0  }
   0x9   :  { %s759_s16 = smov 0   ;;  %s761_s17 = smov 0  }
   0xa LB: > { %s444_s18 = sadd.s32 4294967295, %s723_s17   ;;  %s445_s19 = sadd.s32 4294967294, %s723_s17   ;;  %s723_s17 = sphi %s761_s17, %s21_s17   ;;  %s719_s16 = sphi %s759_s16, %s958_s16   ;;  %s715_s15 = sphi %s757_s15, %s957_s15   ;;  %s711_s14 = sphi %s755_s14, %s956_s14   ;;  %s707_s13 = sphi %s753_s13, %s955_s13   ;;  %s703_s12 = sphi %s751_s12, %s954_s12  }
   0xb   : > { %s42_s20 = sadd.s32 1, %s711_s14  ;;  %p49_p0 = scmp.ne.s32.totalorder %s711_s14, %s707_s13 }
   0xc   : > { %p50_p1 = scmp.eq.s32.totalorder %s723_s17, 0  ;;  %p55_p2 = scmp.ne.s32.totalorder %s707_s13, %s703_s12 }
   0xd   : > { %p789_p3 = scmp.eq.s32.totalorder %s444_s18, 0  ;;  %p123_p4 = scmp.eq.s32.totalorder %s444_s18, 1 }
   0xe   : > { %p793_p5 = por %p50_p1, %p49_p0  ;;  %p129_p6 = scmp.eq.s32.totalorder %s445_s19, 1 }
   0xf   : > { %p799_p7 = por %p789_p3, %p55_p2  ;;  %p803_p8 = por %p123_p4, %p49_p0 }
  0x10   : > { %p807_p9 = por %p129_p6, %p55_p2  ;;  %p446_p10 = scmp.ge.s32.totalorder %s723_s17, 1 }
  0x11   : > { %p136_p11 = scmp.lt.s32.totalorder %s723_s17, 3  ;;  %s951_s1 = sld [smem:[#allocation14_spill]] }
  0x12   : > { %p449_p13 = scmp.ge.s32.totalorder %s723_s17, 2  ;;  %p515_p0 = scmp.lt.s32.totalorder %s723_s17, 2 }
  0x13   : > { %p816_p12 = pnand %p446_p10, %p136_p11  ;;  %s158_s5 = sshll.u32 %s943_s2, 4  ;;  %s159_s5 = int_to_ptr.vmem [resolvable:$true] %s158_s5 }
  0x14   : > { %p829_p2 = pnand %p515_p0, %p793_p5  ;;  %s725_s7 = smov [#allocation7]  }
  0x15   : > { %p498_p1 = pneg %p816_p12  ;;  %s726_s8 = smov [#allocation8]  }
  0x16   : > { %s33_s9 = sadd.s32 1, %s719_s16  ;;  %s169_s10 = sand.u32 1, %s711_s14  }
  0x17   : > { %s148_s28 = sshll.u32 %s951_s1, 4  ;;  %p499_p4 = pnand %p498_p1, %p789_p3  ;;  %s149_s28 = int_to_ptr.hbm [resolvable:$true] %s148_s28 }
  0x18   : > { %p35_p6 = scmp.ge.s32.totalorder %s33_s9, 2  ;;  %s450_s11 = sshll.u32 %s169_s10, 3 }
  0x19   : > { %501 = dma.hbm_to_smem (!%p499_p4), %s149_s28, 16, %s725_s7, [#allocation5]  }
  0x1a   : > { %504 = dma.vmem_to_smem (!%p499_p4), %s159_s5, 16, %s726_s8, [#allocation6]  }
  0x1b   : > { %s484_s18 = sshll.u32 %s719_s16, 3  ;;  %s960_s9 = smov (%p35_p6, %s33_s9), 0 }
  0x1c   : > { %s179_s26 = scalar_lea.hbm %s941_s0, %s484_s18  ;;  %s37_s27 = ssub.s32 %s719_s16, %s960_s9 }
  0x1d   : > { %s180_s30 = sshll.u32 %s179_s26, 4  ;;  %p40_p5 = scmp.eq.s32.totalorder %s37_s27, 0  ;;  %s181_s30 = int_to_ptr.hbm [resolvable:$true] %s180_s30 }
  0x1e   : > { %s173_s28 = scalar_lea.vmem [#allocation2], %s450_s11  ;;  %s170_s7 = scalar_lea.sflag [#allocation3], %s169_s10 }
  0x1f   : > { %s182_s4 = sshll.u32 %s173_s28, 4  ;;  %s727_s8 = smov 32   ;;  %s183_s4 = int_to_ptr.vmem [resolvable:$true] %s182_s4 }
  0x20   : > { %s848_s5 = scalar_select %p40_p5, %s711_s14, %s42_s20  }
  0x21   : > { %s728_s1 = smov 2   ;;  %194 = sbr.rel (%p816_p12) target bundleno = 82 (0x52), region = 32 }
  0x22   : > { %508 = dma.hbm_to_vmem [thread:$0]  (!%p829_p2), %s181_s30, 128, %s183_s4, %s170_s7, %s727_s8, %s727_s8, %s728_s1  }
  0x23   : > { %s855_s18 = sand.u32 (!%p816_p12), 1, %s707_s13  }
  0x24   : > { %s454_s11 = sshll.u32 (!%p816_p12), %s855_s18, 3  ;;  %s197_s19 = scalar_lea.sflag (!%p816_p12), [#allocation3], %s855_s18 }
  0x25   : > { %s200_s20 = scalar_lea.vmem (!%p816_p12), [#allocation2], %s454_s11 }
  0x26   : > { %686 = dma.done.wait (%p799_p7), %s197_s19, 128  }
  0x27   : > { %688 = vsyncadd (%p799_p7), %s197_s19, 4294967168 }
  0x28   : > { %690 = dma.done.wait (%p789_p3), [#allocation5], 16  }
  0x29   : > { %692 = vsyncadd (%p789_p3), [#allocation5], 4294967280 }
  0x2a   : > { %694 = dma.done.wait (%p789_p3), [#allocation6], 16  }
  0x2b   : > { %696 = vsyncadd (%p789_p3), [#allocation6], 4294967280 }
  0x2c   : > { %216 = sfence }
  0x2d   : > { %s239_s1 = sld [smem:[#allocation7]]  ;;  %v235_v0 = vld [vmem:[%s200_s20] sm:$0x3]  ;;  %v236_v1 = vld [vmem:[%s200_s20 + $0x2] sm:$0x3] }
  0x2e   : > { %s458_s29 = sld [smem:[#allocation7 + $0x1]]  ;;  %v875_v2 = vld [vmem:[%s200_s20 + $0x4] sm:$0x3]  ;;  %v877_v4 = vld [vmem:[%s200_s20 + $0x6] sm:$0x3] }
  0x2f   : > { %s459_s6 = sld [smem:[#allocation7 + $0x2]] }
  0x30   : > { %s460_s10 = sld [smem:[#allocation7 + $0x3]] }
  0x31   : > { %s873_s23 = sld [smem:[#allocation8]] }
  0x32   : > { %s461_s22 = sld [smem:[#allocation7 + $0x4]] }
  0x33   : > { %v240_v3 = vstv %s239_s1  ;;  %s462_s26 = sld [smem:[#allocation7 + $0x5]] }
  0x34   : > { %v241_v5 = vmul.f32 %v240_v3, %v235_v0  ;;  %v243_v6 = vstv %s458_s29  ;;  %s463_s21 = sld [smem:[#allocation7 + $0x6]] }
  0x35   : > { %v244_v7 = vmul.f32 %v243_v6, %v236_v1  ;;  %v247_v8 = vstv %s459_s6  ;;  %s464_s27 = sld [smem:[#allocation7 + $0x7]]  ;;  %s890_s6 = scalar_lea.vmem [#allocation9], %s454_s11 }
  0x36   : > { %v248_v9 = vmul.f32 %v247_v8, %v875_v2  ;;  %v251_v10 = vstv %s460_s10  ;;  %s880_s30 = sld [smem:[#allocation8 + $0x1]]  ;;  %s485_s11 = sshll.u32 %s715_s15, 3 }
  0x37   : > { %v245_v11 = vadd.f32 %v244_v7, %v241_v5  ;;  %v252_v12 = vmul.f32 %v251_v10, %v877_v4  ;;  %s467_s28 = sld [smem:[#allocation7 + $0x8]]  ;;  %v255_v17 = vstv %s873_s23  ;;  %s332_s15 = sshll.u32 %s890_s6, 4  ;;  %s333_s15 = int_to_ptr.vmem [resolvable:$true] %s332_s15 }
  0x38   : > { %v259_v13 = vstv %s461_s22  ;;  %s468_s4 = sld [smem:[#allocation7 + $0x9]] }
  0x39   : > { %v249_v14 = vadd.f32 %v248_v9, %v245_v11  ;;  %v260_v15 = vmul.f32 %v259_v13, %v235_v0  ;;  %v262_v16 = vstv %s462_s26  ;;  %s469_s7 = sld [smem:[#allocation7 + $0xa]] }
  0x3a   : > { %v263_v18 = vmul.f32 %v262_v16, %v236_v1  ;;  %v266_v19 = vstv %s463_s21  ;;  %s470_s8 = sld [smem:[#allocation7 + $0xb]]  ;;  %s331_s21 = scalar_lea.hbm %s944_s3, %s485_s11 }
  0x3b   : > { %v253_v20 = vadd.f32 %v252_v12, %v249_v14  ;;  %v267_v21 = vmul.f32 %v266_v19, %v875_v2  ;;  %v270_v22 = vstv %s464_s27  ;;  %s885_s19 = sld [smem:[#allocation8 + $0x2]]  ;;  %s334_s27 = sshll.u32 %s331_s21, 4  ;;  %s335_s27 = int_to_ptr.hbm [resolvable:$true] %s334_s27 }
  0x3c   : > { %v264_v23 = vadd.f32 %v263_v18, %v260_v15  ;;  %v271_v24 = vmul.f32 %v270_v22, %v877_v4  ;;  %s473_s20 = sld [smem:[#allocation7 + $0xc]]  ;;  %v274_v30 = vstv %s880_s30  ;;  %s319_s30 = scalar_lea.sflag [#allocation4], %s855_s18 }
  0x3d   : > { %v256_v25 = vadd.f32 %v255_v17, %v253_v20  ;;  %v279_v26 = vstv %s467_s28  ;;  %s474_s1 = sld [smem:[#allocation7 + $0xd]]  ;;  %s647_s28 = sshra.s32 %s335_s27, 4  ;;  %s648_s28 = int_to_ptr.hbm [resolvable:$true] %s647_s28 }
  0x3e   : > { %v268_v27 = vadd.f32 %v267_v21, %v264_v23  ;;  %v280_v28 = vmul.f32 %v279_v26, %v235_v0  ;;  %v282_v29 = vstv %s468_s4  ;;  %s475_s29 = sld [smem:[#allocation7 + $0xe]]  ;;  %s649_s4 = scalar_lea.hbm %s648_s28, 8 }
  0x3f   : > { %257 = vst [vmem:[%s890_s6] sm:$0x3] %v256_v25  ;;  %v283_v31 = vmul.f32 %v282_v29, %v236_v1  ;;  %v286_v32 = vstv %s469_s7  ;;  %s476_s10 = sld [smem:[#allocation7 + $0xf]]  ;;  %p650_p3 = scmp.ne.s32.totalorder %s648_s28, %s649_s4 }
  0x40   : > { %v272_v33 = vadd.f32 %v271_v24, %v268_v27  ;;  %v287_v34 = vmul.f32 %v286_v32, %v875_v2  ;;  %v290_v35 = vstv %s470_s8  ;;  %s477_s23 = sld [smem:[#allocation8 + $0x3]]  ;;  %p654_p11 = scmp.lt.s32.totalorder %s648_s28, %s944_s3 }
  0x41   : > { %v284_v36 = vadd.f32 %v283_v31, %v280_v28  ;;  %v291_v37 = vmul.f32 %v290_v35, %v877_v4  ;;  %v294_v43 = vstv %s885_s19  ;;  %p651_p7 = pnand %p650_p3, %p803_p8  ;;  %s653_s19 = scalar_lea.hbm %s944_s3, 16 }
  0x42   : > { %v275_v38 = vadd.f32 %v274_v30, %v272_v33  ;;  %v299_v39 = vstv %s473_s20  ;;  %p655_p12 = scmp.lt.s32.totalorder %s653_s19, %s649_s4 }
  0x43   : > { %v288_v40 = vadd.f32 %v287_v34, %v284_v36  ;;  %v300_v41 = vmul.f32 %v299_v39, %v235_v0  ;;  %v302_v42 = vstv %s474_s1  ;;  %p652_p10 = pneg %p651_p7 }
  0x44   : > { %466 = vst [vmem:[%s890_s6 + $0x2] sm:$0x3] %v275_v38  ;;  %v303_v44 = vmul.f32 %v302_v42, %v236_v1  ;;  %v306_v45 = vstv %s475_s29  ;;  %p656_p0 = por %p655_p12, %p654_p11 }
  0x45   : > { %v292_v46 = vadd.f32 %v291_v37, %v288_v40  ;;  %v307_v47 = vmul.f32 %v306_v45, %v875_v2  ;;  %v310_v48 = vstv %s476_s10 }
  0x46   : > { %v304_v49 = vadd.f32 %v303_v44, %v300_v41  ;;  %v311_v50 = vmul.f32 %v310_v48, %v877_v4  ;;  %v314_v53 = vstv %s477_s23  ;;  %p657_p1 = pnand %p656_p0, %p652_p10 }
  0x47   : > { %v295_v51 = vadd.f32 %v294_v43, %v292_v46 }
  0x48   : > { %v308_v52 = vadd.f32 %v307_v47, %v304_v49 }
  0x49   : > { %472 = vst [vmem:[%s890_s6 + $0x4] sm:$0x3] %v295_v51 }
  0x4a   : > { %v312_v54 = vadd.f32 %v311_v50, %v308_v52 }
  0x4c   : > { %v315_v55 = vadd.f32 %v314_v53, %v312_v54 }
  0x4e   : > { %478 = vst [vmem:[%s890_s6 + $0x6] sm:$0x3] %v315_v55 }
  0x4f   : > { %660 = shalt.err (!%p657_p1)
}
  0x50   : > { %s729_s18 = smov 32   ;;  %s730_s29 = smov 2  }
  0x51   : > { %496 = dma.vmem_to_hbm [thread:$0]  (%p803_p8), %s333_s15, 128, %s335_s27, %s319_s30, %s729_s18, %s729_s18, %s730_s29  }
  0x52 PF: > { %s349_s6 = sand.u32 1, %s703_s12   ;;  %p510_p2 = pnand %p449_p13, %p807_p9 }
  0x53   : > { %s350_s10 = scalar_lea.sflag [#allocation4], %s349_s6 }
  0x54   : > { %p511_p4 = pneg %p510_p2 }
  0x56   : > { %698 = dma.done.wait (%p511_p4), %s350_s10, 128  }
  0x57   : > { %700 = vsyncadd (%p511_p4), %s350_s10, 4294967168  ;;  %s21_s17 = sadd.s32 1, %s723_s17   ;;  %s954_s12 = smov %s707_s13 }
  0x58   : > { %p18_p6 = scmp.ge.s32.totalorder %s21_s17, 4   ;;  %s955_s13 = smov %s711_s14 }
  0x59   : > { %s956_s14 = smov %s848_s5  ;;  %s957_s15 = smov %s719_s16 }
  0x5a   : > { %s958_s16 = smov %s960_s9  ;;  %20 = sbr.rel (!%p18_p6) target bundleno = 10 (0xa), region = 90 }
  0x5f   :  { %356 = vsyncpa [#allocation3], 1 }
  0x60   :  { %358 = vsyncpa [#allocation3 + $0x1], 1 }
  0x61   :  { %359 = vsyncpa [#allocation4], 1 }
  0x62   :  { %361 = vsyncpa [#allocation4 + $0x1], 1 }
  0x63   :  { %362 = vsyncpa [#allocation5], 1 }
  0x64   :  { %364 = vsyncpa [#allocation5 + $0x1], 1 }
  0x65   :  { %365 = vsyncpa [#allocation6], 1 }
  0x66   :  { %367 = vsyncpa [#allocation6 + $0x1], 1 }

</bundles_post_ra>
